<compile_context>
chip_gen: v7x
topology: tpu7x:2x2x1
jax: 0.10.0
libtpu: 0.0.40
codegen_flags: <defaults>
</compile_context>

<pallas_src>
import functools

import jax
import jax.numpy as jnp
from jax.experimental import pallas as pl
from jax.experimental.pallas import tpu as pltpu


def _round_up(x, m):
    return ((x + m - 1) // m) * m


def _agg_kernel(*refs, tk, xw_resident, deg_col):
    """One (dst_tile, src_tile) step of  out = (A @ XW) * in_deg^{-1/2} + bias.

    refs layout:
      deg_col is not None: (adj, xw, bias, out, acc)        in-degree read from acc
      deg_col is None:     (adj, xw, bias, nd, out, acc)    norm_dst passed in
    """
    if deg_col is None:
        adj_ref, xw_ref, b_ref, nd_ref, o_ref, acc_ref = refs
    else:
        adj_ref, xw_ref, b_ref, o_ref, acc_ref = refs

    k = pl.program_id(1)

    @pl.when(k == 0)
    def _init():
        acc_ref[...] = jnp.zeros_like(acc_ref)

    # int8 (exact 0/1) -> bf16 right before the dot: HBM/DMA stays 1 B per edge,
    # the MXU gets a native bf16 x bf16 matmul with f32 accumulation. The convert
    # is VPU work hidden under the adjacency DMA.
    a = adj_ref[...].astype(jnp.bfloat16)
    if xw_resident:
        # XW lives in VMEM once; slice the tk rows for this reduction step.
        xw = xw_ref[pl.ds(pl.multiple_of(k * tk, 128), tk), :]
    else:
        xw = xw_ref[...]
    acc_ref[...] += jnp.dot(a, xw, preferred_element_type=jnp.float32)

    # Epilogue only once per output tile: destination norm + bias.
    @pl.when(k == pl.num_programs(1) - 1)
    def _finalize():
        acc = acc_ref[...]
        if deg_col is None:
            norm_dst = nd_ref[...]
        else:
            # The all-ones padding column of XW makes acc[:, deg_col] the exact
            # in-degree (0/1 products accumulated in f32 by the MXU).
            deg = acc[:, deg_col:deg_col + 1]
            norm_dst = jax.lax.rsqrt(jnp.maximum(deg, 1.0))
        o_ref[...] = (acc * norm_dst + b_ref[...]).astype(o_ref.dtype)


@functools.partial(jax.jit, static_argnames=("tm", "tk", "xw_resident"))
def graph_conv(adj, x, weight, bias, *, tm=1024, tk=4096, xw_resident=None):
    """GraphConv forward. adj: (N, N), adj[d, s] = 1 iff edge s -> d (0/1 values)."""
    n = adj.shape[0]
    fin, fout = weight.shape
    del fin

    # ---- adjacency quantized ONCE to int8 (0/1 exact); every subsequent pass
    # over the N^2 array (wrapper reduction + kernel stream) reads 1 B/edge. -----
    adj_q = adj if adj.dtype == jnp.int8 else adj.astype(jnp.int8)

    # Source (out-degree) normalization is needed before the projection, so it
    # stays in the wrapper, computed on the 1-byte copy.
    out_deg = jnp.sum(adj_q, axis=0, dtype=jnp.int32).astype(jnp.float32)
    norm_src = jax.lax.rsqrt(jnp.maximum(out_deg, 1.0))

    # Tiny dense projection in f32; streamed to the kernel as bf16 (only XW picks
    # up ~1e-3 relative rounding — the 0/1 adjacency and degrees stay exact).
    xw = jnp.dot(x.astype(jnp.float32) * norm_src[:, None],
                 weight.astype(jnp.float32),
                 preferred_element_type=jnp.float32)              # (N, fout) f32

    # ---- geometry -------------------------------------------------------------
    # Reserve one padding lane for the in-degree column when that is free
    # (fout not a multiple of 128); otherwise fall back to a wrapper-computed
    # destination norm rather than adding a whole extra 128-lane block of work.
    fout_pad = _round_up(fout + 1, 128)
    use_deg_col = fout_pad == _round_up(fout, 128)
    if not use_deg_col:
        fout_pad = _round_up(fout, 128)

    # int8 sublane packing -> tm multiple of 32; lane axis -> tk multiple of 128.
    # Cap tm at ~n/2 so the "parallel" dst axis has >=2 tiles (v7x dual-TC).
    tm = _round_up(min(tm, _round_up((n + 1) // 2, 32)), 32)
    tk = _round_up(min(tk, _round_up(n, 128)), 128)
    n_dst_pad = _round_up(n, tm)
    n_src_pad = _round_up(n, tk)

    if xw_resident is None:
        # Keep XW VMEM-resident (fetched once) when its double-buffered bf16 copy
        # is small; otherwise stream one (tk, fout_pad) slice per reduction step.
        xw_resident = n_src_pad * fout_pad * 2 <= (4 << 20)

    # ---- padded operands (skip pads that are no-ops) ---------------------------
    if adj_q.shape != (n_dst_pad, n_src_pad):
        adj_q = jnp.pad(adj_q, ((0, n_dst_pad - n), (0, n_src_pad - n)))

    xw_p = jnp.zeros((n_src_pad, fout_pad), jnp.bfloat16)
    xw_p = xw_p.at[:n, :fout].set(xw.astype(jnp.bfloat16))
    if use_deg_col:
        xw_p = xw_p.at[:n, fout_pad - 1].set(1.0)                 # degree column

    b_p = jnp.zeros((1, fout_pad), jnp.float32).at[0, :fout].set(
        bias.astype(jnp.float32))

    in_specs = [
        pl.BlockSpec((tm, tk), lambda i, k: (i, k)),              # adjacency tile
        (pl.BlockSpec((n_src_pad, fout_pad), lambda i, k: (0, 0)) # resident XW
         if xw_resident else
         pl.BlockSpec((tk, fout_pad), lambda i, k: (k, 0))),      # streamed XW
        pl.BlockSpec((1, fout_pad), lambda i, k: (0, 0)),         # bias
    ]
    operands = [adj_q, xw_p, b_p]

    if not use_deg_col:
        # Fallback: in-degree on the padded 1-byte copy (padded cols are zero).
        in_deg = jnp.sum(adj_q, axis=1, dtype=jnp.int32).astype(jnp.float32)
        nd_p = jax.lax.rsqrt(jnp.maximum(in_deg, 1.0))[:, None]   # (n_dst_pad, 1)
        in_specs.append(pl.BlockSpec((tm, 1), lambda i, k: (i, 0)))
        operands.append(nd_p)

    grid = (n_dst_pad // tm, n_src_pad // tk)

    # VMEM budget: int8 adj double-buffer + in-kernel bf16 upcast + XW + out + acc,
    # with headroom; capped at 64 MiB so the same config fits v7x's 64 MiB/TC.
    vmem_bytes = (
        2 * tm * tk * 1
        + tm * tk * 2
        + 2 * (n_src_pad if xw_resident else tk) * fout_pad * 2
        + 2 * tm * fout_pad * 4
        + tm * fout_pad * 4
        + (1 << 20)
    )
    vmem_limit = min(max(int(1.5 * vmem_bytes), 16 << 20), 64 << 20)

    kernel = functools.partial(
        _agg_kernel, tk=tk, xw_resident=xw_resident,
        deg_col=(fout_pad - 1) if use_deg_col else None)

    out = pl.pallas_call(
        kernel,
        out_shape=jax.ShapeDtypeStruct((n_dst_pad, fout_pad), jnp.float32),
        grid_spec=pltpu.PrefetchScalarGridSpec(
            num_scalar_prefetch=0,
            grid=grid,
            in_specs=in_specs,
            out_specs=pl.BlockSpec((tm, fout_pad), lambda i, k: (i, 0)),
            scratch_shapes=[pltpu.VMEM((tm, fout_pad), jnp.float32)],
        ),
        compiler_params=pltpu.CompilerParams(
            dimension_semantics=("parallel", "arbitrary"),
            vmem_limit_bytes=vmem_limit,
        ),
    )(*operands)

    return out[:n, :fout]


def graph_conv_ref(adj, x, weight, bias):
    adj = adj.astype(jnp.float32)
    out_deg = jnp.clip(adj.sum(axis=0), 1.0, None)
    in_deg = jnp.clip(adj.sum(axis=1), 1.0, None)
    feat_src = x * (out_deg ** -0.5)[:, None]
    rst = adj @ (feat_src @ weight)
    rst = rst * (in_deg ** -0.5)[:, None]
    return rst + bias[None, :]


if __name__ == "__main__":
    # in_feats > out_feats branch; N chosen so the grid has multiple dst and src
    # tiles (exercises accumulator init/finalize, degree column, padding paths).
    N, IN_FEATS, OUT_FEATS = 200, 32, 16

    key = jax.random.PRNGKey(0)
    k_adj, k_x, k_w, k_b = jax.random.split(key, 4)

    # Random directed graph with self-loops (no 0-in-degree nodes).
    adj = (jax.random.uniform(k_adj, (N, N)) < 0.05).astype(jnp.float32)
    adj = jnp.maximum(adj, jnp.eye(N, dtype=jnp.float32))
    x = jax.random.normal(k_x, (N, IN_FEATS), dtype=jnp.float32)

    # Deterministic xavier_uniform_-style weight; small nonzero bias to exercise
    # the bias add (module init is zeros, forward accepts any value).
    bound = (6.0 / (IN_FEATS + OUT_FEATS)) ** 0.5
    weight = jax.random.uniform(k_w, (IN_FEATS, OUT_FEATS), minval=-bound,
                                maxval=bound, dtype=jnp.float32)
    bias = 0.1 * jax.random.normal(k_b, (OUT_FEATS,), dtype=jnp.float32)

    ref = graph_conv_ref(adj, x, weight, bias)

    def check(out, name):
        out = jax.block_until_ready(out)
        assert out.shape == ref.shape, (name, out.shape)
        err = float(jnp.max(jnp.abs(out - ref)))
        assert jnp.allclose(out, ref, atol=2e-2, rtol=2e-2), (name, err)

    # Multi-tile grid (4 dst x 2 src), VMEM-resident XW, in-kernel degree column.
    check(graph_conv(adj, x, weight, bias, tm=64, tk=128), "tiled/resident")
    # Streamed-XW path.
    check(graph_conv(adj, x, weight, bias, tm=64, tk=128, xw_resident=False),
          "tiled/streamed")
    # Default (large, problem-clamped) tiles.
    check(graph_conv(adj, x, weight, bias), "default-tiles")

    # fout % 128 == 0 -> wrapper-computed destination-norm fallback path.
    OUT2 = 128
    bound2 = (6.0 / (IN_FEATS + OUT2)) ** 0.5
    weight2 = jax.random.uniform(k_w, (IN_FEATS, OUT2), minval=-bound2,
                                 maxval=bound2, dtype=jnp.float32)
    bias2 = 0.1 * jax.random.normal(k_b, (OUT2,), dtype=jnp.float32)
    ref2 = graph_conv_ref(adj, x, weight2, bias2)
    out2 = jax.block_until_ready(graph_conv(adj, x, weight2, bias2, tm=64, tk=128))
    assert out2.shape == ref2.shape
    assert jnp.allclose(out2, ref2, atol=2e-2, rtol=2e-2), \
        float(jnp.max(jnp.abs(out2 - ref2)))

    print("KERNEL_OK")
</pallas_src>

<mosaic_0001>
module attributes {stable_mosaic.version = 11 : i64} {
  func.func @_agg_kernel(%arg0: i32, %arg1: i32, %arg2: memref<64x128xi8, #tpu.memory_space<vmem>>, %arg3: memref<256x128xbf16, #tpu.memory_space<vmem>>, %arg4: memref<1x128xf32, #tpu.memory_space<vmem>>, %arg5: memref<64x128xf32, #tpu.memory_space<vmem>>, %arg6: memref<64x128xf32, #tpu.memory_space<vmem>>) attributes {dimension_semantics = [#tpu.dimension_semantics<parallel>, #tpu.dimension_semantics<arbitrary>], iteration_bounds = array<i64: 4, 2>, scalar_prefetch = 0 : i64, scratch_operands = 1 : i64, tpu.core_type = #tpu.core_type<tc>, window_params = [{transform_indices = @transform_0, window_bounds = array<i64: 64, 128>}, {pipeline_mode = #tpu.pipeline_mode<synchronous>, transform_indices = @transform_1, window_bounds = array<i64: 256, 128>}, {pipeline_mode = #tpu.pipeline_mode<synchronous>, transform_indices = @transform_2, window_bounds = array<i64: 1, 128>}, {transform_indices = @transform_3, window_bounds = array<i64: 64, 128>}]} {
    %c0_i32 = arith.constant 0 : i32
    %0 = arith.cmpi eq, %arg1, %c0_i32 : i32
    %1 = arith.extui %0 : i1 to i32
    %c0_i32_0 = arith.constant 0 : i32
    %2 = arith.cmpi ne, %1, %c0_i32_0 : i32
    scf.if %2 {
      %cst_8 = arith.constant 0.000000e+00 : f32
      %16 = vector.broadcast %cst_8 : f32 to vector<64x128xf32>
      %c0_9 = arith.constant 0 : index
      %c0_10 = arith.constant 0 : index
      %17 = vector.load %arg6[%c0_9, %c0_10] : memref<64x128xf32, #tpu.memory_space<vmem>>, vector<64x128xf32>
      tpu.vector_store %arg6[%c0_9, %c0_10], %16 {strides = array<i32>} : memref<64x128xf32, #tpu.memory_space<vmem>>, vector<64x128xf32>,
    } else {
    }
    %c0 = arith.constant 0 : index
    %c0_1 = arith.constant 0 : index
    %3 = vector.load %arg2[%c0, %c0_1] : memref<64x128xi8, #tpu.memory_space<vmem>>, vector<64x128xi8>
    %4 = arith.sitofp %3 : vector<64x128xi8> to vector<64x128xbf16>
    %c128_i32 = arith.constant 128 : i32
    %5 = arith.muli %arg1, %c128_i32 : i32
    %6 = tpu.assume_multiple %5, 128 : i32
    %7 = arith.index_cast %6 : i32 to index
    %c0_2 = arith.constant 0 : index
    %8 = vector.load %arg3[%7, %c0_2] : memref<256x128xbf16, #tpu.memory_space<vmem>>, vector<128x128xbf16>
    %c0_3 = arith.constant 0 : index
    %c0_4 = arith.constant 0 : index
    %9 = vector.load %arg6[%c0_3, %c0_4] : memref<64x128xf32, #tpu.memory_space<vmem>>, vector<64x128xf32>
    %cst = arith.constant dense<0.000000e+00> : vector<64x128xf32>
    %10 = tpu.matmul %4, %8, %cst {dimension_numbers = #tpu.dot_dimension_numbers<[1], [0], [0], [1], [0, 0, 1, 1], [], []>} : vector<64x128xbf16>, vector<128x128xbf16>, vector<64x128xf32> -> vector<64x128xf32>
    %11 = arith.addf %9, %10 : vector<64x128xf32>
    %c0_5 = arith.constant 0 : index
    %c0_6 = arith.constant 0 : index
    %12 = vector.load %arg6[%c0_5, %c0_6] : memref<64x128xf32, #tpu.memory_space<vmem>>, vector<64x128xf32>
    tpu.vector_store %arg6[%c0_5, %c0_6], %11 {strides = array<i32>} : memref<64x128xf32, #tpu.memory_space<vmem>>, vector<64x128xf32>,
    %c1_i32 = arith.constant 1 : i32
    %13 = arith.cmpi eq, %arg1, %c1_i32 : i32
    %14 = arith.extui %13 : i1 to i32
    %c0_i32_7 = arith.constant 0 : i32
    %15 = arith.cmpi ne, %14, %c0_i32_7 : i32
    scf.if %15 {
      %c0_8 = arith.constant 0 : index
      %c0_9 = arith.constant 0 : index
      %16 = vector.load %arg6[%c0_8, %c0_9] : memref<64x128xf32, #tpu.memory_space<vmem>>, vector<64x128xf32>
      %17 = vector.extract_strided_slice %16 {offsets = [0, 127], sizes = [64, 1], strides = [1, 1]} : vector<64x128xf32> to vector<64x1xf32>
      %cst_10 = arith.constant 1.000000e+00 : f32
      %18 = vector.broadcast %cst_10 : f32 to vector<64x1xf32>
      %19 = arith.maximumf %17, %18 : vector<64x1xf32>
      %20 = math.rsqrt %19 : vector<64x1xf32>
      %21 = vector.broadcast %20 : vector<64x1xf32> to vector<64x128xf32>
      %22 = arith.mulf %16, %21 : vector<64x128xf32>
      %c0_11 = arith.constant 0 : index
      %c0_12 = arith.constant 0 : index
      %23 = vector.load %arg4[%c0_11, %c0_12] : memref<1x128xf32, #tpu.memory_space<vmem>>, vector<1x128xf32>
      %24 = vector.broadcast %23 : vector<1x128xf32> to vector<64x128xf32>
      %25 = arith.addf %22, %24 : vector<64x128xf32>
      %c0_13 = arith.constant 0 : index
      %c0_14 = arith.constant 0 : index
      %26 = vector.load %arg5[%c0_13, %c0_14] : memref<64x128xf32, #tpu.memory_space<vmem>>, vector<64x128xf32>
      tpu.vector_store %arg5[%c0_13, %c0_14], %25 {strides = array<i32>} : memref<64x128xf32, #tpu.memory_space<vmem>>, vector<64x128xf32>,
    } else {
    }
    return
  }
  func.func @transform_0(%arg0: i32, %arg1: i32) -> (i32, i32) {
    %c0_i32 = arith.constant 0 : i32
    return %arg0, %arg1 : i32, i32
  }
  func.func @transform_1(%arg0: i32, %arg1: i32) -> (i32, i32) {
    %c0_i32 = arith.constant 0 : i32
    %c0_i32_0 = arith.constant 0 : i32
    %c0_i32_1 = arith.constant 0 : i32
    return %c0_i32, %c0_i32_0 : i32, i32
  }
  func.func @transform_2(%arg0: i32, %arg1: i32) -> (i32, i32) {
    %c0_i32 = arith.constant 0 : i32
    %c0_i32_0 = arith.constant 0 : i32
    %c0_i32_1 = arith.constant 0 : i32
    return %c0_i32, %c0_i32_0 : i32, i32
  }
  func.func @transform_3(%arg0: i32, %arg1: i32) -> (i32, i32) {
    %c0_i32 = arith.constant 0 : i32
    %c0_i32_0 = arith.constant 0 : i32
    return %arg0, %c0_i32 : i32, i32
  }
}

</mosaic_0001>

<bundles_post_ra>
// kernel: graph_conv.1
= control target key start
LH: loop header
LB: loop body
LE: loop exit
PB: predicated region body
PF: predicated region fallthrough
CT: control target
= control target key end

     0   :  { %s824_s12 = smov 0   ;;  %s826_s13 = smov 0   ;;  %s941_s0 = inlined_call_operand.vmem [shape: s8[256,256], index: 0, kind: input, shape index: {}]   ;;  %s942_s1 = inlined_call_operand.vmem [shape: bf16[256,128], index: 1, kind: input, shape index: {}]   ;;  %s943_s2 = inlined_call_operand.vmem [shape: f32[1,128], index: 2, kind: input, shape index: {}]   ;;  %s944_s3 = inlined_call_operand.vmem [shape: f32[256,128], index: 3, kind: output, shape index: {}]  }
   0x1   :  { %s828_s14 = smov 0   ;;  %s830_s15 = smov 0  }
   0x2   :  { %s832_s16 = smov 0   ;;  %s834_s17 = smov 0  }
   0x3   :  { %s836_s18 = smov 0  }
   0x4 LB: > { %s22_s19 = sadd.s32 1, %s792_s16  ;;  %s25_s20 = sadd.s32 1, %s796_s17  ;;  %s800_s18 = sphi %s836_s18, %s13_s18   ;;  %s796_s17 = sphi %s834_s17, %s950_s17   ;;  %s792_s16 = sphi %s832_s16, %s949_s16   ;;  %s788_s15 = sphi %s830_s15, %s948_s15   ;;  %s784_s14 = sphi %s828_s14, %s947_s14   ;;  %s780_s13 = sphi %s826_s13, %s946_s13   ;;  %s776_s12 = sphi %s824_s12, %s945_s12  }
   0x5   : > { %p23_p0 = scmp.ge.s32.totalorder %s22_s19, 2  ;;  %p41_p1 = scmp.ne.s32.totalorder %s780_s13, %s776_s12 }
   0x6   : > { %p42_p2 = scmp.eq.s32.totalorder %s800_s18, 0  ;;  %s34_s24 = sadd.s32 1, %s780_s13 }
   0x7   : > { %s952_s19 = smov (%p23_p0, %s22_s19), 0  ;;  %s954_s20 = smov (!%p23_p0, %s25_s20), %s796_s17 }
   0x8   : > { %p43_p3 = por %p42_p2, %p41_p1  ;;  %p27_p4 = scmp.ge.s32.totalorder %s954_s20, 4 }
   0x9   : > { %s30_s21 = ssub.s32 %s792_s16, %s952_s19  ;;  %p585_p6 = scmp.ge.s32.totalorder %s800_s18, 8 }
   0xa   : > { %s956_s20 = smov (%p27_p4, %s954_s20), 0 }
   0xb   : > { %s29_s22 = ssub.s32 %s796_s17, %s956_s20  ;;  %141 = sbr.rel (%p585_p6) target bundleno = 25 (0x19), region = 24 }
   0xc   : > { %s31_s23 = sor.u32 %s30_s21, %s29_s22 }
   0xd   : > { %p32_p5 = scmp.eq.s32.totalorder %s31_s23, 0 }
   0xf   : > { %s875_s25 = scalar_select %p32_p5, %s780_s13, %s34_s24  }
  0x12   : > { %144 = sbr.rel (!%p43_p3) target bundleno = 25 (0x19), region = 28  ;;  %s146_s26 = sand.u32 (%p43_p3), 1, %s780_s13  }
  0x13   : > { %s609_s27 = sshll.u32 (%p43_p3), %s796_s17, 2  ;;  %s586_s28 = sshll.u32 (%p43_p3), %s146_s26, 4 }
  0x14   : > { %s151_s29 = sadd.s32 (%p43_p3), %s792_s16, %s609_s27  ;;  %s148_s7 = scalar_lea.vmem (%p43_p3), [#allocation3], %s586_s28 }
  0x15   : > { %s589_s30 = sshll.u32 (%p43_p3), %s151_s29, 3 }
  0x16   : > { %s153_s6 = scalar_lea.vmem (%p43_p3), %s941_s0, %s589_s30 }
  0x17   : > { %v183_v0 = vld [vmem:[%s153_s6] sm:$0xff] (%p43_p3)  ;;  %v185_v1 = vld [vmem:[%s153_s6 + $0x10] sm:$0xff] (%p43_p3) }
  0x18   : > { %184 = vst [vmem:[%s148_s7] sm:$0xff] (%p43_p3), %v183_v0  ;;  %186 = vst [vmem:[%s148_s7 + $0x8] sm:$0xff] (%p43_p3), %v185_v1 }
  0x19 PF: > { %p590_p7 = scmp.ge.s32.totalorder %s800_s18, 1  ;;  %p191_p8 = scmp.lt.s32.totalorder %s800_s18, 9 }
  0x1b   : > { %p192_p9 = pnand %p590_p7, %p191_p8 }
  0x1c   : > { %s198_s8 = sand.u32 (!%p192_p9), 1, %s776_s12   ;;  %s592_s9 = sshll.u32 (!%p192_p9), %s788_s15, 3 }
  0x1d   : > { %195 = sbr.rel (%p192_p9) target bundleno = 461 (0x1cd), region = 66  ;;  %s591_s10 = sshll.u32 (!%p192_p9), %s198_s8, 4 }
  0x1e   : > { %p223_p10 = scmp.lt.s32.totalorder (!%p192_p9), %s592_s9, 31  ;;  %s200_s24 = scalar_lea.vmem (!%p192_p9), [#allocation3], %s591_s10 }
  0x1f   : > { %p594_p11 = scmp.ne.s32.totalorder (!%p192_p9), %s784_s14, 0 }
  0x24   : > { %s958_s9 = smov (!%p223_p10, %s592_s9), 31  ;;  %232 = sbr.rel (%p594_p11) target bundleno = 43 (0x2b), region = 74 }
  0x25   : > { %s593_s11 = sshll.u32 %s958_s9, 3  ;;  %v802_v2 = vmov (!%p594_p11), 0.0  }
  0x26   : > { %s891_s23 = scalar_lea.vmem %s944_s3, %s593_s11  ;;  %233 = vst [vmem:[#allocation2] sm:$0xff] (!%p594_p11), %v802_v2  ;;  %234 = vst [vmem:[#allocation2 + $0x8] sm:$0xff] (!%p594_p11), %v802_v2 }
  0x27   : > { %235 = vst [vmem:[#allocation2 + $0x10] sm:$0xff] (!%p594_p11), %v802_v2  ;;  %236 = vst [vmem:[#allocation2 + $0x18] sm:$0xff] (!%p594_p11), %v802_v2 }
  0x28   : > { %237 = vst [vmem:[#allocation2 + $0x20] sm:$0xff] (!%p594_p11), %v802_v2  ;;  %238 = vst [vmem:[#allocation2 + $0x28] sm:$0xff] (!%p594_p11), %v802_v2 }
  0x29   : > { %239 = vst [vmem:[#allocation2 + $0x30] sm:$0xff] (!%p594_p11), %v802_v2  ;;  %240 = vst [vmem:[#allocation2 + $0x38] sm:$0xff] (!%p594_p11), %v802_v2 }
  0x2b PF: > { %s595_s12 = sshll.u32 %s784_s14, 7  ;;  %v241_v3 = vld [vmem:[%s200_s24] sm:$0xff]  ;;  %v242_v4 = vld [vmem:[%s200_s24 + $0x8] sm:$0xff]  ;;  %p605_p12 = scmp.ne.s32.totalorder %s784_s14, 1 }
  0x2c   : > { %s248_s15 = sshra.s32 %s595_s12, 3  ;;  %v243_v5 = vunpack.c.l.s8.bf16 %v241_v3  ;;  %v245_v6 = vunpack.c.l.s8.bf16 %v242_v4  ;;  %v244_v15 = vunpack.c.h.s8.bf16 %v241_v3  ;;  %v246_v16 = vunpack.c.h.s8.bf16 %v242_v4  ;;  %v606_v2 = vld [vmem:[%s943_s2] ss:$0 sm:$0xff] (!%p605_p12) }
  0x2d   : > { %s596_s26 = sshll.u32 %s248_s15, 2  ;;  %v268_v19 = vld [vmem:[#allocation2] sm:$0xff]  ;;  %v269_v29 = vld [vmem:[#allocation2 + $0x8] sm:$0xff]  ;;  %v803_v44 = vmov (!%p605_p12), 127  }
  0x2e   : > { %s898_s29 = scalar_lea.vmem %s942_s1, %s596_s26  ;;  %638 = vmatprep.mubr.bf16.mxu0 %v243_v5  ;;  %642 = vmatprep.mubr.bf16.mxu1 %v245_v6  ;;  %v270_v17 = vld [vmem:[#allocation2 + $0x10] sm:$0xff]  ;;  %v271_v23 = vld [vmem:[#allocation2 + $0x18] sm:$0xff] }
  0x2f   : > { %v720_v7 = vld [vmem:[%s898_s29] sm:$0xff]   ;;  %v721_v8 = vld [vmem:[%s898_s29 + $0x8] sm:$0xff]   ;;  %v722_v9 = vld [vmem:[%s898_s29 + $0x10] sm:$0xff]   ;;  %729 = vset.pattern.permute.xlu1 (!%p605_p12), %v803_v44  ;;  %728 = vset.pattern.permute.xlu0 (!%p605_p12), %v803_v44 }
  0x30   : > { %622 = vmatprep.subr.bf16.mxu0 %v720_v7  ;;  %646 = vmatprep.subr.bf16.mxu1 %v720_v7  ;;  %v723_v10 = vld [vmem:[%s898_s29 + $0x18] sm:$0xff]   ;;  %v724_v11 = vld [vmem:[%s898_s29 + $0x20] sm:$0xff]   ;;  %v725_v12 = vld [vmem:[%s898_s29 + $0x28] sm:$0xff]  }
  0x31   : > { %623 = vmatpush3.bf16.msra.mxu0 %v720_v7  ;;  %654 = vmatpush3.bf16.msra.mxu1 %v720_v7  ;;  %v726_v13 = vld [vmem:[%s898_s29 + $0x30] sm:$0xff]   ;;  %v727_v14 = vld [vmem:[%s898_s29 + $0x38] sm:$0xff]   ;;  %v272_v20 = vld [vmem:[#allocation2 + $0x20] sm:$0xff] }
  0x32   : > { %624 = vmatprep.subr.bf16.mxu0 %v721_v8  ;;  %647 = vmatprep.subr.bf16.mxu1 %v721_v8  ;;  %v274_v18 = vld [vmem:[#allocation2 + $0x30] sm:$0xff]  ;;  %v275_v24 = vld [vmem:[#allocation2 + $0x38] sm:$0xff]  ;;  %v273_v30 = vld [vmem:[#allocation2 + $0x28] sm:$0xff] }
  0x35   : > { %625 = vmatpush3.bf16.msra.mxu0 %v721_v8  ;;  %655 = vmatpush3.bf16.msra.mxu1 %v721_v8 }
  0x36   : > { %626 = vmatprep.subr.bf16.mxu0 %v722_v9  ;;  %648 = vmatprep.subr.bf16.mxu1 %v722_v9 }
  0x39   : > { %627 = vmatpush3.bf16.msra.mxu0 %v722_v9  ;;  %656 = vmatpush3.bf16.msra.mxu1 %v722_v9 }
  0x3a   : > { %628 = vmatprep.subr.bf16.mxu0 %v723_v10  ;;  %649 = vmatprep.subr.bf16.mxu1 %v723_v10 }
  0x3d   : > { %629 = vmatpush3.bf16.msra.mxu0 %v723_v10  ;;  %657 = vmatpush3.bf16.msra.mxu1 %v723_v10 }
  0x3e   : > { %630 = vmatprep.subr.bf16.mxu0 %v724_v11  ;;  %650 = vmatprep.subr.bf16.mxu1 %v724_v11 }
  0x41   : > { %631 = vmatpush3.bf16.msra.mxu0 %v724_v11  ;;  %658 = vmatpush3.bf16.msra.mxu1 %v724_v11 }
  0x42   : > { %632 = vmatprep.subr.bf16.mxu0 %v725_v12  ;;  %651 = vmatprep.subr.bf16.mxu1 %v725_v12 }
  0x45   : > { %633 = vmatpush3.bf16.msra.mxu0 %v725_v12  ;;  %659 = vmatpush3.bf16.msra.mxu1 %v725_v12 }
  0x46   : > { %634 = vmatprep.subr.bf16.mxu0 %v726_v13  ;;  %652 = vmatprep.subr.bf16.mxu1 %v726_v13 }
  0x49   : > { %635 = vmatpush3.bf16.msra.mxu0 %v726_v13  ;;  %660 = vmatpush3.bf16.msra.mxu1 %v726_v13 }
  0x4a   : > { %636 = vmatprep.subr.bf16.mxu0 %v727_v14  ;;  %653 = vmatprep.subr.bf16.mxu1 %v727_v14 }
  0x4d   : > { %637 = vmatpush3.bf16.msra.mxu0 %v727_v14  ;;  %661 = vmatpush3.bf16.msra.mxu1 %v727_v14 }
  0x50   : > { %639 = vmatmul.mubr.bf16.vlgmr.msra.gmra.mrb[0].mxu0 %v244_v15  ;;  %643 = vmatmul.mubr.bf16.vlgmr.msra.gmra.mrb[0].mxu1 %v246_v16 }
 0x123   : > { %v640_v21 = vpop.f32.mrb[0].mxu0  ;;  %v644_v22 = vpop.f32.mrb[0].mxu1  ;;  %408 = sbr.rel (%p605_p12) target bundleno = 461 (0x1cd), region = 78 }
 0x124   : > { %v391_v25 = vadd.f32 %v640_v21, %v270_v17  ;;  %v395_v26 = vadd.f32 %v644_v22, %v274_v18  ;;  %v358_v27 = vpop.f32.mrb[1].mxu0  ;;  %v374_v28 = vpop.f32.mrb[1].mxu1 }
 0x125   : > { %v389_v31 = vadd.f32 %v358_v27, %v268_v19  ;;  %v393_v32 = vadd.f32 %v374_v28, %v272_v20  ;;  %v641_v33 = vpop.f32.mrb[2].mxu0  ;;  %v645_v34 = vpop.f32.mrb[2].mxu1 }
 0x126   : > { %399 = vst [vmem:[#allocation2 + $0x10] sm:$0xff] %v391_v25  ;;  %403 = vst [vmem:[#allocation2 + $0x30] sm:$0xff] %v395_v26  ;;  %v392_v35 = vadd.f32 %v641_v33, %v271_v23  ;;  %v396_v36 = vadd.f32 %v645_v34, %v275_v24  ;;  %v361_v37 = vpop.f32.mrb[3].mxu0  ;;  %v377_v38 = vpop.f32.mrb[3].mxu1 }
 0x127   : > { %397 = vst [vmem:[#allocation2] sm:$0xff] %v389_v31  ;;  %401 = vst [vmem:[#allocation2 + $0x20] sm:$0xff] %v393_v32  ;;  %v390_v39 = vadd.f32 %v361_v37, %v269_v29  ;;  %v394_v40 = vadd.f32 %v377_v38, %v273_v30 }
 0x128   : > { %400 = vst [vmem:[#allocation2 + $0x18] sm:$0xff] %v392_v35  ;;  %404 = vst [vmem:[#allocation2 + $0x38] sm:$0xff] %v396_v36 }
 0x129   : > { %398 = vst [vmem:[#allocation2 + $0x8] sm:$0xff] %v390_v39  ;;  %402 = vst [vmem:[#allocation2 + $0x28] sm:$0xff] %v394_v40 }
 0x12d   : > { %v411_v41 = vld [vmem:[#allocation2 + $0x10] sm:$0xff] }
 0x12e   : > { %v409_v42 = vld [vmem:[#allocation2] sm:$0xff]  ;;  %v419_v45 = vmax.f32 %v411_v41, 1.0  ;;  %v415_v55 = vld [vmem:[#allocation2 + $0x30] sm:$0xff] }
 0x12f   : > { %v412_v43 = vld [vmem:[#allocation2 + $0x18] sm:$0xff]  ;;  %v417_v46 = vmax.f32 %v409_v42, 1.0  ;;  %v413_v51 = vld [vmem:[#allocation2 + $0x20] sm:$0xff]  ;;  %v423_v57 = vmax.f32 %v415_v55, 1.0 }
 0x130   : > { %v420_v47 = vmax.f32 %v412_v43, 1.0  ;;  %v410_v48 = vld [vmem:[#allocation2 + $0x8] sm:$0xff]  ;;  %730 = vrsqrt.f32 %v419_v45  ;;  %v421_v53 = vmax.f32 %v413_v51, 1.0  ;;  %v416_v54 = vld [vmem:[#allocation2 + $0x38] sm:$0xff] }
 0x131   : > { %v418_v49 = vmax.f32 %v410_v48, 1.0  ;;  %v414_v50 = vld [vmem:[#allocation2 + $0x28] sm:$0xff]  ;;  %732 = vrsqrt.f32 %v417_v46  ;;  %v424_v56 = vmax.f32 %v416_v54, 1.0 }
 0x132   : > { %734 = vrsqrt.f32 %v420_v47  ;;  %v422_v52 = vmax.f32 %v414_v50, 1.0 }
 0x133   : > { %736 = vrsqrt.f32 %v418_v49 }
 0x134   : > { %738 = vrsqrt.f32 %v422_v52 }
 0x135   : > { %740 = vrsqrt.f32 %v421_v53 }
 0x136   : > { %742 = vrsqrt.f32 %v424_v56 }
 0x137   : > { %744 = vrsqrt.f32 %v423_v57 }
 0x13a   : > { %v731_v58 = vpop.eup %730 }
 0x13b   : > { %v733_v59 = vpop.eup %732  ;;  %445 = vperm.xlu1 %729, %v731_v58  }
 0x13c   : > { %v735_v60 = vpop.eup %734  ;;  %435 = vperm.xlu0 %728, %v733_v59  }
 0x13d   : > { %v737_v61 = vpop.eup %736 }
 0x13e   : > { %v739_v62 = vpop.eup %738 }
 0x13f   : > { %450 = vperm.xlu1 %729, %v735_v60   ;;  %v741_v63 = vpop.eup %740 }
 0x140   : > { %440 = vperm.xlu0 %728, %v737_v61   ;;  %v743_v0 = vpop.eup %742 }
 0x141   : > { %v745_v1 = vpop.eup %744 }
 0x143   : > { %460 = vperm.xlu1 %729, %v739_v62  }
 0x144   : > { %455 = vperm.xlu0 %728, %v741_v63  }
 0x147   : > { %470 = vperm.xlu1 %729, %v743_v0  }
 0x148   : > { %465 = vperm.xlu0 %728, %v745_v1  }
 0x1ba   : > { %v446_v3 = vpop.permute.xlu1 %445 }
 0x1bb   : > { %v475_v4 = vmul.f32 %v446_v3, %v411_v41  ;;  %v436_v5 = vpop.permute.xlu0 %435 }
 0x1bc   : > { %v473_v6 = vmul.f32 %v436_v5, %v409_v42 }
 0x1bd   : > { %v490_v7 = vadd.f32 %v606_v2, %v475_v4 }
 0x1be   : > { %v488_v8 = vadd.f32 %v606_v2, %v473_v6  ;;  %v451_v9 = vpop.permute.xlu1 %450 }
 0x1bf   : > { %498 = vst [vmem:[%s891_s23 + $0x10] sm:$0xff] %v490_v7  ;;  %v476_v10 = vmul.f32 %v451_v9, %v412_v43  ;;  %v441_v11 = vpop.permute.xlu0 %440 }
 0x1c0   : > { %496 = vst [vmem:[%s891_s23] sm:$0xff] %v488_v8  ;;  %v474_v12 = vmul.f32 %v441_v11, %v410_v48 }
 0x1c1   : > { %v491_v13 = vadd.f32 %v606_v2, %v476_v10 }
 0x1c2   : > { %v489_v14 = vadd.f32 %v606_v2, %v474_v12  ;;  %v461_v15 = vpop.permute.xlu1 %460 }
 0x1c3   : > { %499 = vst [vmem:[%s891_s23 + $0x18] sm:$0xff] %v491_v13  ;;  %v478_v16 = vmul.f32 %v461_v15, %v414_v50  ;;  %v456_v17 = vpop.permute.xlu0 %455 }
 0x1c4   : > { %497 = vst [vmem:[%s891_s23 + $0x8] sm:$0xff] %v489_v14  ;;  %v477_v18 = vmul.f32 %v456_v17, %v413_v51 }
 0x1c5   : > { %v493_v19 = vadd.f32 %v606_v2, %v478_v16 }
 0x1c6   : > { %v492_v20 = vadd.f32 %v606_v2, %v477_v18  ;;  %v471_v21 = vpop.permute.xlu1 %470 }
 0x1c7   : > { %501 = vst [vmem:[%s891_s23 + $0x28] sm:$0xff] %v493_v19  ;;  %v480_v22 = vmul.f32 %v471_v21, %v416_v54  ;;  %v466_v23 = vpop.permute.xlu0 %465 }
 0x1c8   : > { %500 = vst [vmem:[%s891_s23 + $0x20] sm:$0xff] %v492_v20  ;;  %v479_v24 = vmul.f32 %v466_v23, %v415_v55 }
 0x1c9   : > { %v495_v25 = vadd.f32 %v606_v2, %v480_v22 }
 0x1ca   : > { %v494_v26 = vadd.f32 %v606_v2, %v479_v24 }
 0x1cb   : > { %503 = vst [vmem:[%s891_s23 + $0x38] sm:$0xff] %v495_v25 }
 0x1cc   : > { %502 = vst [vmem:[%s891_s23 + $0x30] sm:$0xff] %v494_v26 }
 0x1cd PF: > { %s13_s18 = sadd.s32 1, %s800_s18   ;;  %s945_s12 = smov %s780_s13 }
 0x1ce   : > { %p10_p13 = scmp.ge.s32.totalorder %s13_s18, 10   ;;  %s946_s13 = smov %s875_s25 }
 0x1cf   : > { %s947_s14 = smov %s792_s16  ;;  %s948_s15 = smov %s796_s17 }
 0x1d0   : > { %s949_s16 = smov %s952_s19  ;;  %s950_s17 = smov %s956_s20 }
 0x1d1   :  { %12 = sbr.rel (!%p10_p13) target bundleno = 4 (0x4), region = 114 }

</bundles_post_ra>
